<compile_context>
chip_gen: v6e
topology: v6e:2x2x1
jax: 0.10.0
libtpu: 0.0.40
codegen_flags: <defaults>
</compile_context>

<pallas_src>
import jax
import jax.numpy as jnp
from jax.experimental import pallas as pl
from jax.experimental.pallas import tpu as pltpu

TEMP = 0.01  # gumbel-softmax temperature (argmax is invariant to tau > 0)


def cognn_kernel(adj_ref, x_ref, wa_ref, ba_ref, gum_ref, wenv_ref, b_ref, out_ref):
    """Single invocation; layers unrolled.  Feature-major layout [F, N].

    adj_ref : [N, N]    A_t[u, v] = multiplicity of edge u -> v  (f32)
    x_ref   : [F, N]    x.T
    wa_ref  : [L, 8, F] per-layer concat(Wa_self^T, Wa_nbr^T)
    ba_ref  : [L, 4, 1] action bias (transposed)
    gum_ref : [L, 4, N] gumbel noise (transposed)
    wenv_ref: [L, F, 2F] per-layer concat(W_self^T, W_nbr^T) along K
    b_ref   : [L, F, 1] env bias (transposed)
    out_ref : [F, N]
    """
    adj = adj_ref[...]                                  # [N, N] f32 (exact ints)
    adj_bf = adj.astype(jnp.bfloat16)                   # exact: small multiplicities
    x = x_ref[...]                                      # [F, N] f32
    n_layers = wa_ref.shape[0]

    for l in range(n_layers):                           # static unroll (L small)
        # ---- action network: fused [8,F]@[F,N], then reassociated nbr term ----
        pre = jnp.dot(wa_ref[l], x, preferred_element_type=jnp.float32)      # [8, N]
        logits = (pre[0:4, :]
                  + jnp.dot(pre[4:8, :], adj, preferred_element_type=jnp.float32)
                  + ba_ref[l])                                               # [4, N]

        # ---- hard gumbel-softmax (forward = argmax one-hot; no /TEMP needed) ----
        # Tie-break: index 0 wins (>=), matching the reference / torch argmax.
        y = logits + gum_ref[l]                                              # [4, N]
        keep_in = (y[0:1, :] >= y[1:2, :]).astype(jnp.float32)               # [1, N]
        keep_out = (y[2:3, :] >= y[3:4, :]).astype(jnp.float32)              # [1, N]

        # ---- environment layer: edge-gated GraphConv ----
        # agg_t[f, v] = keep_in[v] * sum_u A[v,u] * keep_out[u] * x[u, f]
        gated = (keep_out * x).astype(jnp.bfloat16)                          # [F, N] bf16
        agg = keep_in * jnp.dot(gated, adj_bf,
                                preferred_element_type=jnp.float32)          # [F, N] f32

        # fused self + neighbor transform: [F, 2F] @ [2F, N]
        h = jnp.concatenate([x, agg], axis=0)                                # [2F, N]
        x = jnp.dot(wenv_ref[l], h, preferred_element_type=jnp.float32) + b_ref[l]

        # TODO(synk): dropout has p=0.0 (default) -> identity; training-mode dropout
        # and the straight-through gumbel gradient are not implemented (forward only).
        x = jnp.maximum(x, 0.0)                                              # relu

    out_ref[...] = x


def cognn_forward(x, adj, params, gumbel):
    """x: [N, F] f32, adj: [N, N] f32 with adj[v, u] = #edges u->v,
    gumbel: [L, N, 4] f32.  Returns [N, F]."""
    wa_self, wa_nbr, ba, w_self, w_nbr, b = params
    N, F = x.shape

    # ---- layout plumbing (wrapper-side transposes / weight fusion) ----
    x_t = x.T                                                            # [F, N]
    adj_t = adj.T                                                        # [N, N]
    wa_t = jnp.concatenate([jnp.swapaxes(wa_self, 1, 2),
                            jnp.swapaxes(wa_nbr, 1, 2)], axis=1)         # [L, 8, F]
    ba_t = jnp.swapaxes(ba, 1, 2)                                        # [L, 4, 1]
    gum_t = jnp.swapaxes(gumbel, 1, 2)                                   # [L, 4, N]
    wenv_t = jnp.concatenate([jnp.swapaxes(w_self, 1, 2),
                              jnp.swapaxes(w_nbr, 1, 2)], axis=2)        # [L, F, 2F]
    b_t = jnp.swapaxes(b, 1, 2)                                          # [L, F, 1]

    vmem = pl.BlockSpec(memory_space=pltpu.MemorySpace.VMEM)
    out_t = pl.pallas_call(
        cognn_kernel,
        out_shape=jax.ShapeDtypeStruct((F, N), jnp.float32),
        in_specs=[vmem] * 7,
        out_specs=vmem,
    )(adj_t, x_t, wa_t, ba_t, gum_t, wenv_t, b_t)

    return out_t.T                                                       # [N, F]


def ref_forward(x, adj, params, gumbel):
    """Pure-JAX f32 reference mirroring the PyTorch module semantics."""
    wa_self, wa_nbr, ba, w_self, w_nbr, b = params
    for l in range(gumbel.shape[0]):
        nbr = adj @ x
        logits = x @ wa_self[l] + nbr @ wa_nbr[l] + ba[l]
        y = (logits + gumbel[l]) / TEMP
        keep_in = (y[:, 0:1] >= y[:, 1:2]).astype(jnp.float32)
        keep_out = (y[:, 2:3] >= y[:, 3:4]).astype(jnp.float32)
        agg = keep_in * (adj @ (keep_out * x))
        x = jnp.maximum(x @ w_self[l] + agg @ w_nbr[l] + b[l], 0.0)
    return x


if __name__ == "__main__":
    N, F, L, E = 128, 32, 2, 512   # nodes, hidden dim, env layers, edges

    key = jax.random.PRNGKey(0)
    k_x, k_u, k_v, k_g, *k_w = jax.random.split(key, 10)

    x = jax.random.normal(k_x, (N, F), dtype=jnp.float32)

    # edge_index [2, E]; densify into adjacency A[v, u] (rows = destination)
    u = jax.random.randint(k_u, (E,), 0, N)
    v = jax.random.randint(k_v, (E,), 0, N)
    adj = jnp.zeros((N, N), jnp.float32).at[v, u].add(1.0)

    # deterministic parameter init (per-layer GraphConv weights)
    wa_self = 0.1 * jax.random.normal(k_w[0], (L, F, 4), jnp.float32)
    wa_nbr = 0.1 * jax.random.normal(k_w[1], (L, F, 4), jnp.float32)
    ba = 0.1 * jax.random.normal(k_w[2], (L, 1, 4), jnp.float32)
    w_self = 0.1 * jax.random.normal(k_w[3], (L, F, F), jnp.float32)
    w_nbr = 0.1 * jax.random.normal(k_w[4], (L, F, F), jnp.float32)
    b = 0.1 * jax.random.normal(k_w[5], (L, 1, F), jnp.float32)
    params = (wa_self, wa_nbr, ba, w_self, w_nbr, b)

    # gumbel noise for F.gumbel_softmax (one draw per layer, node, action logit)
    gumbel = jax.random.gumbel(k_g, (L, N, 4), dtype=jnp.float32)

    out = cognn_forward(x, adj, params, gumbel)
    out = jax.block_until_ready(out)

    ref = ref_forward(x, adj, params, gumbel)
    assert out.shape == (N, F)
    assert bool(jnp.all(jnp.isfinite(out)))
    # Tolerance accounts for bf16 MXU inputs on the gated-aggregation matmul
    # (gating logits stay f32, so gate bits match the f32 reference).
    assert jnp.allclose(out, ref, rtol=5e-2, atol=5e-2), float(jnp.max(jnp.abs(out - ref)))

    print("KERNEL_OK")
</pallas_src>

<mosaic_0001>
module attributes {stable_mosaic.version = 11 : i64} {
  func.func @cognn_kernel(%arg0: memref<128x128xf32, #tpu.memory_space<vmem>>, %arg1: memref<32x128xf32, #tpu.memory_space<vmem>>, %arg2: memref<2x8x32xf32, #tpu.memory_space<vmem>>, %arg3: memref<2x4x1xf32, #tpu.memory_space<vmem>>, %arg4: memref<2x4x128xf32, #tpu.memory_space<vmem>>, %arg5: memref<2x32x64xf32, #tpu.memory_space<vmem>>, %arg6: memref<2x32x1xf32, #tpu.memory_space<vmem>>, %arg7: memref<32x128xf32, #tpu.memory_space<vmem>>) attributes {dimension_semantics = [], scalar_prefetch = 0 : i64, scratch_operands = 0 : i64, tpu.core_type = #tpu.core_type<tc>} {
    %c0 = arith.constant 0 : index
    %c0_0 = arith.constant 0 : index
    %0 = vector.load %arg0[%c0, %c0_0] : memref<128x128xf32, #tpu.memory_space<vmem>>, vector<128x128xf32>
    %1 = arith.truncf %0 : vector<128x128xf32> to vector<128x128xbf16>
    %c0_1 = arith.constant 0 : index
    %c0_2 = arith.constant 0 : index
    %2 = vector.load %arg1[%c0_1, %c0_2] : memref<32x128xf32, #tpu.memory_space<vmem>>, vector<32x128xf32>
    %c0_3 = arith.constant 0 : index
    %c0_4 = arith.constant 0 : index
    %c0_5 = arith.constant 0 : index
    %3 = vector.load %arg2[%c0_3, %c0_4, %c0_5] : memref<2x8x32xf32, #tpu.memory_space<vmem>>, vector<1x8x32xf32>
    %4 = vector.shape_cast %3 : vector<1x8x32xf32> to vector<8x32xf32>
    %cst = arith.constant dense<0.000000e+00> : vector<8x128xf32>
    %5 = tpu.matmul %4, %2, %cst {dimension_numbers = #tpu.dot_dimension_numbers<[1], [0], [0], [1], [0, 0, 1, 1], [], []>} : vector<8x32xf32>, vector<32x128xf32>, vector<8x128xf32> -> vector<8x128xf32>
    %6 = vector.extract_strided_slice %5 {offsets = [0, 0], sizes = [4, 128], strides = [1, 1]} : vector<8x128xf32> to vector<4x128xf32>
    %7 = vector.extract_strided_slice %5 {offsets = [4, 0], sizes = [4, 128], strides = [1, 1]} : vector<8x128xf32> to vector<4x128xf32>
    %cst_6 = arith.constant dense<0.000000e+00> : vector<4x128xf32>
    %8 = tpu.matmul %7, %0, %cst_6 {dimension_numbers = #tpu.dot_dimension_numbers<[1], [0], [0], [1], [0, 0, 1, 1], [], []>} : vector<4x128xf32>, vector<128x128xf32>, vector<4x128xf32> -> vector<4x128xf32>
    %9 = arith.addf %6, %8 : vector<4x128xf32>
    %c0_7 = arith.constant 0 : index
    %c0_8 = arith.constant 0 : index
    %c0_9 = arith.constant 0 : index
    %10 = vector.load %arg3[%c0_7, %c0_8, %c0_9] : memref<2x4x1xf32, #tpu.memory_space<vmem>>, vector<1x4x1xf32>
    %11 = vector.shape_cast %10 : vector<1x4x1xf32> to vector<4x1xf32>
    %12 = vector.broadcast %11 : vector<4x1xf32> to vector<4x128xf32>
    %13 = arith.addf %9, %12 : vector<4x128xf32>
    %c0_10 = arith.constant 0 : index
    %c0_11 = arith.constant 0 : index
    %c0_12 = arith.constant 0 : index
    %14 = vector.load %arg4[%c0_10, %c0_11, %c0_12] : memref<2x4x128xf32, #tpu.memory_space<vmem>>, vector<1x4x128xf32>
    %15 = vector.shape_cast %14 : vector<1x4x128xf32> to vector<4x128xf32>
    %16 = arith.addf %13, %15 : vector<4x128xf32>
    %17 = vector.extract_strided_slice %16 {offsets = [0, 0], sizes = [1, 128], strides = [1, 1]} : vector<4x128xf32> to vector<1x128xf32>
    %18 = vector.extract_strided_slice %16 {offsets = [1, 0], sizes = [1, 128], strides = [1, 1]} : vector<4x128xf32> to vector<1x128xf32>
    %19 = arith.cmpf oge, %17, %18 : vector<1x128xf32>
    %20 = arith.extui %19 : vector<1x128xi1> to vector<1x128xi32>
    %21 = arith.sitofp %20 : vector<1x128xi32> to vector<1x128xf32>
    %22 = vector.extract_strided_slice %16 {offsets = [2, 0], sizes = [1, 128], strides = [1, 1]} : vector<4x128xf32> to vector<1x128xf32>
    %23 = vector.extract_strided_slice %16 {offsets = [3, 0], sizes = [1, 128], strides = [1, 1]} : vector<4x128xf32> to vector<1x128xf32>
    %24 = arith.cmpf oge, %22, %23 : vector<1x128xf32>
    %25 = arith.extui %24 : vector<1x128xi1> to vector<1x128xi32>
    %26 = arith.sitofp %25 : vector<1x128xi32> to vector<1x128xf32>
    %27 = vector.broadcast %26 : vector<1x128xf32> to vector<32x128xf32>
    %28 = arith.mulf %27, %2 : vector<32x128xf32>
    %29 = arith.truncf %28 : vector<32x128xf32> to vector<32x128xbf16>
    %cst_13 = arith.constant dense<0.000000e+00> : vector<32x128xf32>
    %30 = tpu.matmul %29, %1, %cst_13 {dimension_numbers = #tpu.dot_dimension_numbers<[1], [0], [0], [1], [0, 0, 1, 1], [], []>} : vector<32x128xbf16>, vector<128x128xbf16>, vector<32x128xf32> -> vector<32x128xf32>
    %31 = vector.broadcast %21 : vector<1x128xf32> to vector<32x128xf32>
    %32 = arith.mulf %31, %30 : vector<32x128xf32>
    %33 = tpu.concatenate %2, %32 in 0 : vector<32x128xf32>, vector<32x128xf32> -> vector<64x128xf32>
    %c0_14 = arith.constant 0 : index
    %c0_15 = arith.constant 0 : index
    %c0_16 = arith.constant 0 : index
    %34 = vector.load %arg5[%c0_14, %c0_15, %c0_16] : memref<2x32x64xf32, #tpu.memory_space<vmem>>, vector<1x32x64xf32>
    %35 = vector.shape_cast %34 : vector<1x32x64xf32> to vector<32x64xf32>
    %cst_17 = arith.constant dense<0.000000e+00> : vector<32x128xf32>
    %36 = tpu.matmul %35, %33, %cst_17 {dimension_numbers = #tpu.dot_dimension_numbers<[1], [0], [0], [1], [0, 0, 1, 1], [], []>} : vector<32x64xf32>, vector<64x128xf32>, vector<32x128xf32> -> vector<32x128xf32>
    %c0_18 = arith.constant 0 : index
    %c0_19 = arith.constant 0 : index
    %c0_20 = arith.constant 0 : index
    %37 = vector.load %arg6[%c0_18, %c0_19, %c0_20] : memref<2x32x1xf32, #tpu.memory_space<vmem>>, vector<1x32x1xf32>
    %38 = vector.shape_cast %37 : vector<1x32x1xf32> to vector<32x1xf32>
    %39 = vector.broadcast %38 : vector<32x1xf32> to vector<32x128xf32>
    %40 = arith.addf %36, %39 : vector<32x128xf32>
    %cst_21 = arith.constant 0.000000e+00 : f32
    %41 = vector.broadcast %cst_21 : f32 to vector<32x128xf32>
    %42 = arith.maximumf %40, %41 : vector<32x128xf32>
    %c1 = arith.constant 1 : index
    %c0_22 = arith.constant 0 : index
    %c0_23 = arith.constant 0 : index
    %43 = vector.load %arg2[%c1, %c0_22, %c0_23] : memref<2x8x32xf32, #tpu.memory_space<vmem>>, vector<1x8x32xf32>
    %44 = vector.shape_cast %43 : vector<1x8x32xf32> to vector<8x32xf32>
    %cst_24 = arith.constant dense<0.000000e+00> : vector<8x128xf32>
    %45 = tpu.matmul %44, %42, %cst_24 {dimension_numbers = #tpu.dot_dimension_numbers<[1], [0], [0], [1], [0, 0, 1, 1], [], []>} : vector<8x32xf32>, vector<32x128xf32>, vector<8x128xf32> -> vector<8x128xf32>
    %46 = vector.extract_strided_slice %45 {offsets = [0, 0], sizes = [4, 128], strides = [1, 1]} : vector<8x128xf32> to vector<4x128xf32>
    %47 = vector.extract_strided_slice %45 {offsets = [4, 0], sizes = [4, 128], strides = [1, 1]} : vector<8x128xf32> to vector<4x128xf32>
    %cst_25 = arith.constant dense<0.000000e+00> : vector<4x128xf32>
    %48 = tpu.matmul %47, %0, %cst_25 {dimension_numbers = #tpu.dot_dimension_numbers<[1], [0], [0], [1], [0, 0, 1, 1], [], []>} : vector<4x128xf32>, vector<128x128xf32>, vector<4x128xf32> -> vector<4x128xf32>
    %49 = arith.addf %46, %48 : vector<4x128xf32>
    %c1_26 = arith.constant 1 : index
    %c0_27 = arith.constant 0 : index
    %c0_28 = arith.constant 0 : index
    %50 = vector.load %arg3[%c1_26, %c0_27, %c0_28] : memref<2x4x1xf32, #tpu.memory_space<vmem>>, vector<1x4x1xf32>
    %51 = vector.shape_cast %50 : vector<1x4x1xf32> to vector<4x1xf32>
    %52 = vector.broadcast %51 : vector<4x1xf32> to vector<4x128xf32>
    %53 = arith.addf %49, %52 : vector<4x128xf32>
    %c1_29 = arith.constant 1 : index
    %c0_30 = arith.constant 0 : index
    %c0_31 = arith.constant 0 : index
    %54 = vector.load %arg4[%c1_29, %c0_30, %c0_31] : memref<2x4x128xf32, #tpu.memory_space<vmem>>, vector<1x4x128xf32>
    %55 = vector.shape_cast %54 : vector<1x4x128xf32> to vector<4x128xf32>
    %56 = arith.addf %53, %55 : vector<4x128xf32>
    %57 = vector.extract_strided_slice %56 {offsets = [0, 0], sizes = [1, 128], strides = [1, 1]} : vector<4x128xf32> to vector<1x128xf32>
    %58 = vector.extract_strided_slice %56 {offsets = [1, 0], sizes = [1, 128], strides = [1, 1]} : vector<4x128xf32> to vector<1x128xf32>
    %59 = arith.cmpf oge, %57, %58 : vector<1x128xf32>
    %60 = arith.extui %59 : vector<1x128xi1> to vector<1x128xi32>
    %61 = arith.sitofp %60 : vector<1x128xi32> to vector<1x128xf32>
    %62 = vector.extract_strided_slice %56 {offsets = [2, 0], sizes = [1, 128], strides = [1, 1]} : vector<4x128xf32> to vector<1x128xf32>
    %63 = vector.extract_strided_slice %56 {offsets = [3, 0], sizes = [1, 128], strides = [1, 1]} : vector<4x128xf32> to vector<1x128xf32>
    %64 = arith.cmpf oge, %62, %63 : vector<1x128xf32>
    %65 = arith.extui %64 : vector<1x128xi1> to vector<1x128xi32>
    %66 = arith.sitofp %65 : vector<1x128xi32> to vector<1x128xf32>
    %67 = vector.broadcast %66 : vector<1x128xf32> to vector<32x128xf32>
    %68 = arith.mulf %67, %42 : vector<32x128xf32>
    %69 = arith.truncf %68 : vector<32x128xf32> to vector<32x128xbf16>
    %cst_32 = arith.constant dense<0.000000e+00> : vector<32x128xf32>
    %70 = tpu.matmul %69, %1, %cst_32 {dimension_numbers = #tpu.dot_dimension_numbers<[1], [0], [0], [1], [0, 0, 1, 1], [], []>} : vector<32x128xbf16>, vector<128x128xbf16>, vector<32x128xf32> -> vector<32x128xf32>
    %71 = vector.broadcast %61 : vector<1x128xf32> to vector<32x128xf32>
    %72 = arith.mulf %71, %70 : vector<32x128xf32>
    %73 = tpu.concatenate %42, %72 in 0 : vector<32x128xf32>, vector<32x128xf32> -> vector<64x128xf32>
    %c1_33 = arith.constant 1 : index
    %c0_34 = arith.constant 0 : index
    %c0_35 = arith.constant 0 : index
    %74 = vector.load %arg5[%c1_33, %c0_34, %c0_35] : memref<2x32x64xf32, #tpu.memory_space<vmem>>, vector<1x32x64xf32>
    %75 = vector.shape_cast %74 : vector<1x32x64xf32> to vector<32x64xf32>
    %cst_36 = arith.constant dense<0.000000e+00> : vector<32x128xf32>
    %76 = tpu.matmul %75, %73, %cst_36 {dimension_numbers = #tpu.dot_dimension_numbers<[1], [0], [0], [1], [0, 0, 1, 1], [], []>} : vector<32x64xf32>, vector<64x128xf32>, vector<32x128xf32> -> vector<32x128xf32>
    %c1_37 = arith.constant 1 : index
    %c0_38 = arith.constant 0 : index
    %c0_39 = arith.constant 0 : index
    %77 = vector.load %arg6[%c1_37, %c0_38, %c0_39] : memref<2x32x1xf32, #tpu.memory_space<vmem>>, vector<1x32x1xf32>
    %78 = vector.shape_cast %77 : vector<1x32x1xf32> to vector<32x1xf32>
    %79 = vector.broadcast %78 : vector<32x1xf32> to vector<32x128xf32>
    %80 = arith.addf %76, %79 : vector<32x128xf32>
    %cst_40 = arith.constant 0.000000e+00 : f32
    %81 = vector.broadcast %cst_40 : f32 to vector<32x128xf32>
    %82 = arith.maximumf %80, %81 : vector<32x128xf32>
    %c0_41 = arith.constant 0 : index
    %c0_42 = arith.constant 0 : index
    %83 = vector.load %arg7[%c0_41, %c0_42] : memref<32x128xf32, #tpu.memory_space<vmem>>, vector<32x128xf32>
    tpu.vector_store %arg7[%c0_41, %c0_42], %82 {strides = array<i32>} : memref<32x128xf32, #tpu.memory_space<vmem>>, vector<32x128xf32>,
    return
  }
}

</mosaic_0001>

<bundles_post_ra>
// kernel: tpu_custom_call.1
= control target key start
LH: loop header
LB: loop body
LE: loop exit
PB: predicated region body
PF: predicated region fallthrough
CT: control target
= control target key end

     0   :  { %12 = vsyncpa [#allocation3], 0  ;;  %s1609_s0 = inlined_call_operand.hbm [shape: f32[128,128], index: 0, kind: input, shape index: {}]   ;;  %s1610_s1 = inlined_call_operand.hbm [shape: f32[32,128], index: 1, kind: input, shape index: {}]   ;;  %s1611_s2 = inlined_call_operand.vmem [shape: f32[2,8,32], index: 2, kind: input, shape index: {}]   ;;  %s1612_s3 = inlined_call_operand.vmem [shape: f32[2,4,1], index: 3, kind: input, shape index: {}]   ;;  %s1613_s4 = inlined_call_operand.hbm [shape: f32[2,4,128], index: 4, kind: input, shape index: {}]   ;;  %s1614_s5 = inlined_call_operand.vmem [shape: f32[2,32,64], index: 5, kind: input, shape index: {}]   ;;  %s1615_s6 = inlined_call_operand.vmem [shape: f32[2,32,1], index: 6, kind: input, shape index: {}]   ;;  %s1616_s7 = inlined_call_operand.hbm [shape: f32[32,128], index: 7, kind: output, shape index: {}]  }
   0x1   :  { %13 = vsyncpa [#allocation6], 0 }
   0x2   :  { %14 = vsyncpa [#allocation4], 0  ;;  %s1229_s24 = smov [#allocation5]   ;;  %s1230_s26 = smov [#allocation2]  }
   0x3   :  { %s32_s25 = sshll.u32 %s1229_s24, 4  ;;  %s20_s27 = sshll.u32 %s1230_s26, 4  ;;  %s33_s25 = int_to_ptr.vmem [resolvable:$true] %s32_s25  ;;  %s21_s27 = int_to_ptr.vmem [resolvable:$true] %s20_s27 }
   0x4   :  { %s1151_s28 = scalar_lea.vmem %s33_s25, 512  ;;  %p1156_p1 = scmp.lt.s32.totalorder %s33_s25, %s33_s25 }
   0x5   :  { %p1152_p0 = scmp.ne.s32.totalorder %s33_s25, %s1151_s28  ;;  %p1157_p2 = scmp.lt.s32.totalorder %s1151_s28, %s1151_s28 }
   0x7   :  { %p1158_p3 = por %p1157_p2, %p1156_p1 }
   0x9   :  { %p1159_p4 = pnand %p1158_p3, %p1152_p0 }
   0xb   :  { %1162 = shalt.err (!%p1159_p4)
}
   0xc   :  { %s1231_s29 = smov 128   ;;  %s1232_s30 = smov 8  }
   0xd   :  { %38 = dma.hbm_to_vmem [thread:$0]  %s1610_s1, 512, %s33_s25, [#allocation6], %s1231_s29, %s1231_s29, %s1232_s30  }
   0xe   :  { %s1171_s10 = scalar_lea.vmem %s21_s27, 2048  ;;  %p1176_p6 = scmp.lt.s32.totalorder %s21_s27, %s21_s27 }
   0xf   :  { %p1172_p5 = scmp.ne.s32.totalorder %s21_s27, %s1171_s10  ;;  %p1177_p7 = scmp.lt.s32.totalorder %s1171_s10, %s1171_s10 }
  0x11   :  { %p1178_p8 = por %p1177_p7, %p1176_p6 }
  0x13   :  { %p1179_p9 = pnand %p1178_p8, %p1172_p5 }
  0x15   :  { %1182 = shalt.err (!%p1179_p9)
}
  0x16   :  { %26 = dma.hbm_to_vmem [thread:$0]  %s1609_s0, 2048, %s21_s27, [#allocation3], %s1231_s29, %s1231_s29, %s1232_s30  }
  0x17   :  { %s1233_s13 = smov [#allocation7]  }
  0x18   :  { %s48_s14 = sshll.u32 %s1233_s13, 4  ;;  %s49_s14 = int_to_ptr.vmem [resolvable:$true] %s48_s14 }
  0x19   :  { %s1191_s15 = scalar_lea.vmem %s49_s14, 128  ;;  %p1196_p11 = scmp.lt.s32.totalorder %s49_s14, %s49_s14 }
  0x1a   :  { %p1192_p10 = scmp.ne.s32.totalorder %s49_s14, %s1191_s15  ;;  %p1197_p12 = scmp.lt.s32.totalorder %s1191_s15, %s1191_s15 }
  0x1c   :  { %p1198_p13 = por %p1197_p12, %p1196_p11 }
  0x1e   :  { %p1199_p0 = pnand %p1198_p13, %p1192_p10 }
  0x20   :  { %1202 = shalt.err (!%p1199_p0)
}
  0x21   :  { %s1234_s1 = smov 64   ;;  %s1235_s16 = smov 4  }
  0x22   :  { %54 = dma.hbm_to_vmem [thread:$0]  %s1613_s4, 128, %s49_s14, [#allocation6], %s1234_s1, %s1234_s1, %s1235_s16  }
  0x23   :  { %1223 = dma.done.wait [#allocation3], 2048  }
  0x24   :  { %1224 = vsyncadd [#allocation3], 4294965248 }
  0x25   :  { %1225 = dma.done.wait [#allocation6], 640  }
  0x26   :  { %1226 = vsyncadd [#allocation6], 4294966656  ;;  %v1236_v0 = vmov 0.0   ;;  %vm1237_vm0 = vmmov 0   ;;  %v1298_v1 = vld [vmem:[#allocation5 + $0x18] sm:$0xff]  ;;  %v1300_v2 = vld [vmem:[#allocation5 + $0x10] sm:$0xff]  ;;  %v261_v39 = vlaneseq }
  0x27   :  { %954 = vmatprep.subr.mxu1 %v1236_v0  ;;  %962 = vmatprep.mubr.msk.f32.mxu1 %vm1237_vm0, %v1236_v0  ;;  %v1303_v3 = vld [vmem:[#allocation5 + $0x8] sm:$0xff]  ;;  %v1305_v4 = vld [vmem:[#allocation2 + $0x78] sm:$0xff]  ;;  %v1308_v5 = vld [vmem:[#allocation2 + $0x70] sm:$0xff]  ;;  %vm98_vm1 = vcmask 261120   ;;  %v1238_v31 = vmov 0   ;;  %vm356_vm3 = vcmask 523264  }
  0x28   :  { %955 = vmatpush3.msra.mxu1 %v1298_v1  ;;  %v1310_v6 = vld [vmem:[#allocation2 + $0x68] sm:$0xff]  ;;  %v1312_v7 = vld [vmem:[#allocation2 + $0x60] sm:$0xff]  ;;  %v1317_v8 = vpack.c.bf16 %v1305_v4, %v1308_v5  ;;  %v1332_v12 = vld [vmem:[#allocation2 + $0x58] sm:$0xff]  ;;  %1141 = vset.pattern.permute.xlu0 %v1238_v31  ;;  %v1447_v46 = vshrl.u32 %v261_v39, 7  ;;  %s1239_s9 = smov [#allocation8]  }
  0x29   :  { %956 = vmatprep.subr.mxu1 %v1236_v0  ;;  %v1321_v9 = vpack.c.bf16 %v1310_v6, %v1312_v7  ;;  %v1324_v10 = vld [vmem:[#allocation5] sm:$0xff]  ;;  %v1334_v13 = vld [vmem:[#allocation2 + $0x50] sm:$0xff]  ;;  %v1349_v15 = vld [vmem:[#allocation2 + $0x48] sm:$0xff]  ;;  %1142 = vset.pattern.permute.xlu1 %v1238_v31  ;;  %s831_s10 = sshll.u32 %s1239_s9, 4  ;;  %s832_s10 = int_to_ptr.vmem [resolvable:$true] %s831_s10 }
  0x2a   :  { %957 = vmatpush3.msra.mxu1 %v1300_v2  ;;  %v97_v11 = vld [vmem:[%s1611_s2] sm:$0xff]  ;;  %1000 = vmatprep.subr.bf16.mxu0 %v1317_v8  ;;  %v1340_v14 = vpack.c.bf16 %v1332_v12, %v1334_v13  ;;  %v1363_v18 = vld [vmem:[#allocation2 + $0x38] sm:$0xff]  ;;  %v1365_v19 = vld [vmem:[#allocation2 + $0x30] sm:$0xff]  ;;  %v263_v49 = vsub.s32 2, %v1447_v46  ;;  %p1208_p2 = scmp.lt.s32.totalorder %s832_s10, %s832_s10 }
  0x2b   :  { %958 = vmatprep.subr.mxu1 %v1236_v0  ;;  %1001 = vmatpush3.bf16.msra.mxu0 %v1317_v8  ;;  %v1351_v16 = vld [vmem:[#allocation2 + $0x40] sm:$0xff]  ;;  %v1371_v20 = vpack.c.bf16 %v1363_v18, %v1365_v19  ;;  %v1377_v21 = vld [vmem:[#allocation2 + $0x28] sm:$0xff]  ;;  %v1391_v24 = vld [vmem:[#allocation2 + $0x18] sm:$0xff] }
  0x2c   :  { %959 = vmatpush3.msra.mxu1 %v1303_v3  ;;  %1002 = vmatprep.subr.bf16.mxu0 %v1321_v9  ;;  %v1357_v17 = vpack.c.bf16 %v1349_v15, %v1351_v16  ;;  %v1379_v22 = vld [vmem:[#allocation2 + $0x20] sm:$0xff]  ;;  %v1393_v25 = vld [vmem:[#allocation2 + $0x10] sm:$0xff]  ;;  %v1418_v27 = vld [vmem:[#allocation2 + $0x8] sm:$0xff] }
  0x2d   :  { %960 = vmatprep.subr.mxu1 %v1236_v0  ;;  %v1385_v23 = vpack.c.bf16 %v1377_v21, %v1379_v22  ;;  %v1399_v26 = vpack.c.bf16 %v1391_v24, %v1393_v25  ;;  %v1422_v28 = vld [vmem:[#allocation2] sm:$0xff]  ;;  %v335_v32 = vld [vmem:[%s1615_s6 + $0x18] sm:$0xff]  ;;  %v860_v35 = vld [vmem:[%s1615_s6 + $0x30] sm:$0xff] }
  0x2e   :  { %961 = vmatpush3.msra.mxu1 %v1324_v10  ;;  %v1426_v29 = vpack.c.bf16 %v1418_v27, %v1422_v28  ;;  %v246_v30 = vld [vmem:[%s1612_s3] sm:$0xf]  ;;  %v334_v59 = vld [vmem:[%s1615_s6 + $0x10] sm:$0xff]  ;;  %v333_v60 = vld [vmem:[%s1615_s6 + $0x8] sm:$0xff] }
  0x2f   :  { %963 = vmatmul.mubr.msk.f32.vlgmr.msra.gmra.mxu1 %vm98_vm1, %v97_v11  ;;  %965 = vmatprep.subr.mxu1 %v1236_v0  ;;  %v332_v33 = vld [vmem:[%s1615_s6] sm:$0xff]  ;;  %v859_v62 = vld [vmem:[%s1615_s6 + $0x28] sm:$0xff]  ;;  %v861_v63 = vld [vmem:[%s1615_s6 + $0x38] sm:$0xff]  ;;  %v322_v11 = vsub.s32 0, %v1447_v46 }
  0x30   :  { %966 = vmatpush3.msra.mxu1 %v1305_v4  ;;  %997 = vmatprep.mubr.msk.f32.mxu1 %vm1237_vm0, %v1236_v0  ;;  %v858_v34 = vld [vmem:[%s1615_s6 + $0x20] sm:$0xff]  ;;  %v329_v39 = vld [vmem:[%s1614_s5 + $0x8] sm:$0xff] }
  0x31   :  { %967 = vmatprep.subr.mxu1 %v1236_v0  ;;  %1003 = vmatpush3.bf16.msra.mxu0 %v1321_v9  ;;  %v253_v43 = vld [vmem:[#allocation7] sm:$0xf]  ;;  %v852_v61 = vld [vmem:[%s1612_s3 + $0x4] sm:$0xf]  ;;  %v855_v46 = vld [vmem:[%s1614_s5 + $0x28] sm:$0xff] }
  0x32   :  { %968 = vmatpush3.msra.mxu1 %v1308_v5  ;;  %1004 = vmatprep.subr.bf16.mxu0 %v1340_v14  ;;  %v328_v58 = vld [vmem:[%s1614_s5] sm:$0xff] }
  0x33   :  { %969 = vmatprep.subr.mxu1 %v1236_v0  ;;  %249 = vperm.xlu0 %1141, %v246_v30  }
  0x34   :  { %970 = vmatpush3.msra.mxu1 %v1310_v6  ;;  %348 = vperm.xlu1 %1142, %v334_v59  }
  0x35   :  { %971 = vmatprep.subr.mxu1 %v1236_v0  ;;  %1005 = vmatpush3.bf16.msra.mxu0 %v1340_v14 }
  0x36   :  { %972 = vmatpush3.msra.mxu1 %v1312_v7  ;;  %1006 = vmatprep.subr.bf16.mxu0 %v1357_v17 }
  0x37   :  { %973 = vmatprep.subr.mxu1 %v1236_v0  ;;  %353 = vperm.xlu0 %1141, %v335_v32  }
  0x38   :  { %974 = vmatpush3.msra.mxu1 %v1332_v12  ;;  %343 = vperm.xlu1 %1142, %v333_v60   ;;  %v856_v60 = vld [vmem:[%s1614_s5 + $0x30] sm:$0xff] }
  0x39   :  { %975 = vmatprep.subr.mxu1 %v1236_v0  ;;  %1007 = vmatpush3.bf16.msra.mxu0 %v1357_v17 }
  0x3a   :  { %976 = vmatpush3.msra.mxu1 %v1334_v13  ;;  %1008 = vmatprep.subr.bf16.mxu0 %v1371_v20 }
  0x3b   :  { %977 = vmatprep.subr.mxu1 %v1236_v0  ;;  %338 = vperm.xlu0 %1141, %v332_v33  }
  0x3c   :  { %978 = vmatpush3.msra.mxu1 %v1349_v15  ;;  %611 = vperm.xlu1 %1142, %v852_v61   ;;  %v857_v61 = vld [vmem:[%s1614_s5 + $0x38] sm:$0xff] }
  0x3d   :  { %979 = vmatprep.subr.mxu1 %v1236_v0  ;;  %1009 = vmatpush3.bf16.msra.mxu0 %v1371_v20 }
  0x3e   :  { %980 = vmatpush3.msra.mxu1 %v1351_v16  ;;  %1010 = vmatprep.subr.bf16.mxu0 %v1385_v23 }
  0x3f   :  { %981 = vmatprep.subr.mxu1 %v1236_v0  ;;  %703 = vperm.xlu0 %1141, %v858_v34  }
  0x40   :  { %982 = vmatpush3.msra.mxu1 %v1363_v18  ;;  %708 = vperm.xlu1 %1142, %v859_v62  }
  0x41   :  { %983 = vmatprep.subr.mxu1 %v1236_v0  ;;  %1011 = vmatpush3.bf16.msra.mxu0 %v1385_v23 }
  0x42   :  { %984 = vmatpush3.msra.mxu1 %v1365_v19  ;;  %1012 = vmatprep.subr.bf16.mxu0 %v1399_v26 }
  0x43   :  { %985 = vmatprep.subr.mxu1 %v1236_v0  ;;  %713 = vperm.xlu0 %1141, %v860_v35  }
  0x44   :  { %986 = vmatpush3.msra.mxu1 %v1377_v21  ;;  %718 = vperm.xlu1 %1142, %v861_v63  }
  0x45   :  { %987 = vmatprep.subr.mxu1 %v1236_v0  ;;  %1013 = vmatpush3.bf16.msra.mxu0 %v1399_v26 }
  0x46   :  { %988 = vmatpush3.msra.mxu1 %v1379_v22  ;;  %1014 = vmatprep.subr.bf16.mxu0 %v1426_v29 }
  0x47   :  { %989 = vmatprep.subr.mxu1 %v1236_v0 }
  0x48   :  { %990 = vmatpush3.msra.mxu1 %v1391_v24 }
  0x49   :  { %991 = vmatprep.subr.mxu1 %v1236_v0  ;;  %1015 = vmatpush3.bf16.msra.mxu0 %v1426_v29 }
  0x4a   :  { %992 = vmatpush3.msra.mxu1 %v1393_v25  ;;  %1042 = vmatprep.subr.mxu0 %v1236_v0 }
  0x4b   :  { %993 = vmatprep.subr.mxu1 %v1236_v0 }
  0x4c   :  { %994 = vmatpush3.msra.mxu1 %v1418_v27 }
  0x4d   :  { %995 = vmatprep.subr.mxu1 %v1236_v0 }
  0x4e   :  { %996 = vmatpush3.msra.mxu1 %v1422_v28 }
  0xae   :  { %v250_v42 = vpop.permute.xlu0 %249 }
  0xef   :  { %v168_v36 = vpop.f32.mrf.mxu1 }
  0xf0   :  { %v173_v37 = vrot.slane %v168_v36, 4 }
  0xf1   :  { %v964_v38 = vpop.f32.mrf.mxu1 }
  0xf2   :  { %998 = vmatmul.mubr.f32.vlgmr.msra.gmra.mxu1 %v173_v37 }
  0xf3   :  { %1036 = vmatprep.mubr.msk.f32.mxu1 %vm356_vm3, %v328_v58 }
 0x1b2   :  { %v241_v40 = vpop.f32.mrf.mxu1 }
 0x1b3   :  { %v245_v41 = vadd.f32 %v241_v40, %v168_v36  ;;  %v330_v40 = vld [vmem:[%s1614_s5 + $0x10] sm:$0xff] }
 0x1b4   :  { %v999_v44 = vpop.f32.mrf.mxu1 }
 0x1b5   :  { %v252_v45 = vadd.f32 %v250_v42, %v245_v41 }
 0x1b7   :  { %v254_v47 = vadd.f32 %v253_v43, %v252_v45 }
 0x1b9   :  { %v256_v48 = vrot.slane %v254_v47, 1 }
 0x1bb   :  { %vm258_vm2 = vcmp.ge.f32.partialorder %v254_v47, %v256_v48  ;;  %v850_v47 = vld [vmem:[%s1611_s2 + $0x8] sm:$0xff] }
 0x1bc   :  { %v845_v50 = vsel %vm258_vm2, 1.0, %v1236_v0 }
 0x1bd   :  { %v264_v51 = vrot.slane %v845_v50, %v263_v49  ;;  %v323_v32 = vrot.slane %v845_v50, %v322_v11 }
 0x1bf   :  { %v265_v52 = vmul.f32 %v264_v51, %v1324_v10  ;;  %v266_v53 = vmul.f32 %v264_v51, %v1303_v3  ;;  %v267_v54 = vmul.f32 %v264_v51, %v1300_v2  ;;  %v268_v55 = vmul.f32 %v264_v51, %v1298_v1 }
 0x1c1   :  { %v269_v56 = vpack.c.bf16 %v266_v53, %v265_v52  ;;  %v270_v57 = vpack.c.bf16 %v268_v55, %v267_v54  ;;  %v854_v52 = vld [vmem:[%s1614_s5 + $0x20] sm:$0xff] }
 0x1c3   :  { %1016 = vmatprep.mubr.bf16.mxu0 %v269_v56 }
 0x1c4   :  { %1017 = vmatmul.mubr.bf16.vlgmr.msra.gmra.mxu0 %v270_v57 }
 0x1c5   :  { %1050 = vmatprep.mubr.msk.f32.mxu0 %vm1237_vm0, %v1236_v0 }
 0x284   :  { %v1018_v30 = vpop.f32.mrf.mxu0 }
 0x285   :  { %v326_v36 = vmul.f32 %v1018_v30, %v323_v32 }
 0x286   :  { %v305_v31 = vpop.f32.mrf.mxu0 }
 0x287   :  { %v324_v38 = vmul.f32 %v323_v32, %v305_v31 }
 0x288   :  { %v1019_v33 = vpop.f32.mrf.mxu0 }
 0x289   :  { %v327_v34 = vmul.f32 %v1019_v33, %v323_v32 }
 0x28a   :  { %v308_v35 = vpop.f32.mrf.mxu0 }
 0x28b   :  { %1020 = vmatprep.subr.mxu1 %v327_v34  ;;  %v325_v37 = vmul.f32 %v323_v32, %v308_v35 }
 0x28c   :  { %1021 = vmatpush3.msra.mxu1 %v327_v34 }
 0x28d   :  { %1022 = vmatprep.subr.mxu1 %v326_v36 }
 0x28e   :  { %1023 = vmatpush3.msra.mxu1 %v326_v36 }
 0x28f   :  { %1024 = vmatprep.subr.mxu1 %v325_v37 }
 0x290   :  { %1025 = vmatpush3.msra.mxu1 %v325_v37 }
 0x291   :  { %1026 = vmatprep.subr.mxu1 %v324_v38 }
 0x292   :  { %1027 = vmatpush3.msra.mxu1 %v324_v38 }
 0x293   :  { %1028 = vmatprep.subr.mxu1 %v1298_v1 }
 0x294   :  { %1029 = vmatpush3.msra.mxu1 %v1298_v1  ;;  %v331_v1 = vld [vmem:[%s1614_s5 + $0x18] sm:$0xff]  ;;  %s1203_s5 = scalar_lea.vmem %s832_s10, 512 }
 0x295   :  { %1030 = vmatprep.subr.mxu1 %v1300_v2  ;;  %p1204_p1 = scmp.ne.s32.totalorder %s832_s10, %s1203_s5  ;;  %p1209_p3 = scmp.lt.s32.totalorder %s1203_s5, %s1203_s5 }
 0x296   :  { %1031 = vmatpush3.msra.mxu1 %v1300_v2  ;;  %v349_v2 = vpop.permute.xlu1 %348 }
 0x297   :  { %1032 = vmatprep.subr.mxu1 %v1303_v3  ;;  %p1210_p4 = por %p1209_p3, %p1208_p2 }
 0x298   :  { %1033 = vmatpush3.msra.mxu1 %v1303_v3 }
 0x299   :  { %1034 = vmatprep.subr.mxu1 %v1324_v10  ;;  %p1211_p5 = pnand %p1210_p4, %p1204_p1 }
 0x29a   :  { %1035 = vmatpush3.msra.mxu1 %v1324_v10 }
 0x29b   :  { %1037 = vmatmul.mubr.msk.f32.vlgmr.msra.gmra.mxu1 %vm356_vm3, %v329_v39  ;;  %1088 = vmatprep.subr.bf16.mxu1 %v1317_v8 }
 0x29c   :  { %1039 = vmatprep.mubr.msk.f32.mxu1 %vm356_vm3, %v330_v40  ;;  %1089 = vmatpush3.bf16.msra.mxu1 %v1317_v8  ;;  %v354_v8 = vpop.permute.xlu0 %353 }
 0x29d   :  { %1090 = vmatprep.subr.bf16.mxu1 %v1321_v9 }
 0x29f   :  { %1040 = vmatmul.mubr.msk.f32.gmra.mxu1 %vm356_vm3, %v331_v1 }
 0x2a0   :  { %1091 = vmatpush3.bf16.msra.mxu1 %v1321_v9  ;;  %v339_v43 = vpop.permute.xlu0 %338 }
 0x2a1   :  { %1092 = vmatprep.subr.bf16.mxu1 %v1340_v14 }
 0x2a4   :  { %1093 = vmatpush3.bf16.msra.mxu1 %v1340_v14  ;;  %v704_v63 = vpop.permute.xlu0 %703 }
 0x2a5   :  { %1094 = vmatprep.subr.bf16.mxu1 %v1357_v17 }
 0x2a8   :  { %1095 = vmatpush3.bf16.msra.mxu1 %v1357_v17  ;;  %v344_v17 = vpop.permute.xlu1 %343  ;;  %v714_v38 = vpop.permute.xlu0 %713 }
 0x2a9   :  { %1096 = vmatprep.subr.bf16.mxu1 %v1371_v20 }
 0x2ac   :  { %1097 = vmatpush3.bf16.msra.mxu1 %v1371_v20 }
 0x2ad   :  { %1098 = vmatprep.subr.bf16.mxu1 %v1385_v23 }
 0x2b0   :  { %1099 = vmatpush3.bf16.msra.mxu1 %v1385_v23 }
 0x2b1   :  { %1100 = vmatprep.subr.bf16.mxu1 %v1399_v26 }
 0x2b4   :  { %1101 = vmatpush3.bf16.msra.mxu1 %v1399_v26 }
 0x2b5   :  { %1102 = vmatprep.subr.bf16.mxu1 %v1426_v29 }
 0x2b8   :  { %1103 = vmatpush3.bf16.msra.mxu1 %v1426_v29 }
 0x35b   :  { %v1038_v3 = vpop.f32.mrf.mxu1 }
 0x35c   :  { %v441_v41 = vadd.f32 %v1038_v3, %v344_v17 }
 0x35d   :  { %v435_v9 = vpop.f32.mrf.mxu1 }
 0x35e   :  { %v436_v44 = vadd.f32 %v435_v9, %v339_v43  ;;  %v1523_v26 = vmax.f32 %v441_v41, 0.0 }
 0x35f   :  { %v1041_v10 = vpop.f32.mrf.mxu1 }
 0x360   :  { %v451_v14 = vadd.f32 %v1041_v10, %v354_v8  ;;  %v1527_v29 = vmax.f32 %v436_v44, 0.0 }
 0x361   :  { %v445_v20 = vpop.f32.mrf.mxu1 }
 0x362   :  { %v1517_v42 = vmax.f32 %v451_v14, 0.0  ;;  %v446_v23 = vadd.f32 %v445_v20, %v349_v2 }
 0x364   :  { %v1519_v45 = vmax.f32 %v446_v23, 0.0  ;;  %1043 = vmatpush3.msra.mxu0 %v1517_v42 }
 0x365   :  { %1044 = vmatprep.subr.mxu0 %v1236_v0 }
 0x366   :  { %1045 = vmatpush3.msra.mxu0 %v1519_v45 }
 0x367   :  { %1046 = vmatprep.subr.mxu0 %v1236_v0 }
 0x368   :  { %1047 = vmatpush3.msra.mxu0 %v1523_v26 }
 0x369   :  { %1048 = vmatprep.subr.mxu0 %v1236_v0 }
 0x36a   :  { %1049 = vmatpush3.msra.mxu0 %v1527_v29 }
 0x36b   :  { %1051 = vmatmul.mubr.msk.f32.vlgmr.msra.gmra.mxu0 %vm98_vm1, %v850_v47  ;;  %1053 = vmatprep.subr.mxu0 %v1236_v0 }
 0x36c   :  { %1054 = vmatpush3.msra.mxu0 %v1305_v4  ;;  %1085 = vmatprep.mubr.msk.f32.mxu0 %vm1237_vm0, %v1236_v0 }
 0x36d   :  { %1055 = vmatprep.subr.mxu0 %v1236_v0 }
 0x36e   :  { %1056 = vmatpush3.msra.mxu0 %v1308_v5 }
 0x36f   :  { %1057 = vmatprep.subr.mxu0 %v1236_v0 }
 0x370   :  { %1058 = vmatpush3.msra.mxu0 %v1310_v6 }
 0x371   :  { %1059 = vmatprep.subr.mxu0 %v1236_v0 }
 0x372   :  { %1060 = vmatpush3.msra.mxu0 %v1312_v7 }
 0x373   :  { %1061 = vmatprep.subr.mxu0 %v1236_v0 }
 0x374   :  { %1062 = vmatpush3.msra.mxu0 %v1332_v12 }
 0x375   :  { %1063 = vmatprep.subr.mxu0 %v1236_v0 }
 0x376   :  { %1064 = vmatpush3.msra.mxu0 %v1334_v13  ;;  %v612_v13 = vpop.permute.xlu1 %611 }
 0x377   :  { %1065 = vmatprep.subr.mxu0 %v1236_v0 }
 0x378   :  { %1066 = vmatpush3.msra.mxu0 %v1349_v15  ;;  %v616_v15 = vld [vmem:[#allocation7 + $0x4] sm:$0xf] }
 0x379   :  { %1067 = vmatprep.subr.mxu0 %v1236_v0 }
 0x37a   :  { %1068 = vmatpush3.msra.mxu0 %v1351_v16  ;;  %v709_v62 = vpop.permute.xlu1 %708 }
 0x37b   :  { %1069 = vmatprep.subr.mxu0 %v1236_v0 }
 0x37c   :  { %1070 = vmatpush3.msra.mxu0 %v1363_v18 }
 0x37d   :  { %1071 = vmatprep.subr.mxu0 %v1236_v0 }
 0x37e   :  { %1072 = vmatpush3.msra.mxu0 %v1365_v19  ;;  %v719_v34 = vpop.permute.xlu1 %718 }
 0x37f   :  { %1073 = vmatprep.subr.mxu0 %v1236_v0 }
 0x380   :  { %1074 = vmatpush3.msra.mxu0 %v1377_v21 }
 0x381   :  { %1075 = vmatprep.subr.mxu0 %v1236_v0 }
 0x382   :  { %1076 = vmatpush3.msra.mxu0 %v1379_v22 }
 0x383   :  { %1077 = vmatprep.subr.mxu0 %v1236_v0 }
 0x384   :  { %1078 = vmatpush3.msra.mxu0 %v1391_v24 }
 0x385   :  { %1079 = vmatprep.subr.mxu0 %v1236_v0 }
 0x386   :  { %1080 = vmatpush3.msra.mxu0 %v1393_v25 }
 0x387   :  { %1081 = vmatprep.subr.mxu0 %v1236_v0 }
 0x388   :  { %1082 = vmatpush3.msra.mxu0 %v1418_v27 }
 0x389   :  { %1083 = vmatprep.subr.mxu0 %v1236_v0 }
 0x38a   :  { %1084 = vmatpush3.msra.mxu0 %v1422_v28 }
 0x42b   :  { %v529_v4 = vpop.f32.mrf.mxu0 }
 0x42c   :  { %v534_v5 = vrot.slane %v529_v4, 4 }
 0x42d   :  { %v1052_v6 = vpop.f32.mrf.mxu0 }
 0x42e   :  { %1086 = vmatmul.mubr.f32.vlgmr.msra.gmra.mxu0 %v534_v5 }
 0x42f   :  { %1124 = vmatprep.mubr.msk.f32.mxu0 %vm356_vm3, %v854_v52 }
 0x4ee   :  { %v602_v7 = vpop.f32.mrf.mxu0 }
 0x4ef   :  { %v606_v12 = vadd.f32 %v602_v7, %v529_v4 }
 0x4f0   :  { %v1087_v16 = vpop.f32.mrf.mxu0 }
 0x4f1   :  { %v614_v18 = vadd.f32 %v612_v13, %v606_v12 }
 0x4f3   :  { %v617_v19 = vadd.f32 %v616_v15, %v614_v18 }
 0x4f5   :  { %v619_v21 = vrot.slane %v617_v19, 1 }
 0x4f7   :  { %vm621_vm4 = vcmp.ge.f32.partialorder %v617_v19, %v619_v21 }
 0x4f8   :  { %v853_v22 = vsel %vm621_vm4, 1.0, %v1236_v0 }
 0x4f9   :  { %v627_v24 = vrot.slane %v853_v22, %v263_v49  ;;  %v686_v53 = vrot.slane %v853_v22, %v322_v11 }
 0x4fb   :  { %v628_v25 = vmul.f32 %v627_v24, %v1527_v29  ;;  %v629_v27 = vmul.f32 %v627_v24, %v1523_v26  ;;  %v630_v28 = vmul.f32 %v627_v24, %v1519_v45  ;;  %v631_v48 = vmul.f32 %v627_v24, %v1517_v42 }
 0x4fd   :  { %v632_v50 = vpack.c.bf16 %v629_v27, %v628_v25  ;;  %v633_v51 = vpack.c.bf16 %v631_v48, %v630_v28 }
 0x4ff   :  { %1104 = vmatprep.mubr.bf16.mxu1 %v632_v50 }
 0x500   :  { %1105 = vmatmul.mubr.bf16.vlgmr.msra.gmra.mxu1 %v633_v51 }
 0x5c0   :  { %v1106_v0 = vpop.f32.mrf.mxu1 }
 0x5c1   :  { %v689_v57 = vmul.f32 %v1106_v0, %v686_v53 }
 0x5c2   :  { %v668_v49 = vpop.f32.mrf.mxu1 }
 0x5c3   :  { %v687_v59 = vmul.f32 %v686_v53, %v668_v49 }
 0x5c4   :  { %v1107_v54 = vpop.f32.mrf.mxu1 }
 0x5c5   :  { %v690_v55 = vmul.f32 %v1107_v54, %v686_v53 }
 0x5c6   :  { %v671_v56 = vpop.f32.mrf.mxu1 }
 0x5c7   :  { %1108 = vmatprep.subr.mxu0 %v690_v55  ;;  %v688_v58 = vmul.f32 %v686_v53, %v671_v56 }
 0x5c8   :  { %1109 = vmatpush3.msra.mxu0 %v690_v55 }
 0x5c9   :  { %1110 = vmatprep.subr.mxu0 %v689_v57 }
 0x5ca   :  { %1111 = vmatpush3.msra.mxu0 %v689_v57 }
 0x5cb   :  { %1112 = vmatprep.subr.mxu0 %v688_v58 }
 0x5cc   :  { %1113 = vmatpush3.msra.mxu0 %v688_v58 }
 0x5cd   :  { %1114 = vmatprep.subr.mxu0 %v687_v59 }
 0x5ce   :  { %1115 = vmatpush3.msra.mxu0 %v687_v59 }
 0x5cf   :  { %1116 = vmatprep.subr.mxu0 %v1517_v42 }
 0x5d0   :  { %1117 = vmatpush3.msra.mxu0 %v1517_v42 }
 0x5d1   :  { %1118 = vmatprep.subr.mxu0 %v1519_v45 }
 0x5d2   :  { %1119 = vmatpush3.msra.mxu0 %v1519_v45 }
 0x5d3   :  { %1120 = vmatprep.subr.mxu0 %v1523_v26 }
 0x5d4   :  { %1121 = vmatpush3.msra.mxu0 %v1523_v26 }
 0x5d5   :  { %1122 = vmatprep.subr.mxu0 %v1527_v29 }
 0x5d6   :  { %1123 = vmatpush3.msra.mxu0 %v1527_v29 }
 0x5d7   :  { %1125 = vmatmul.mubr.msk.f32.vlgmr.msra.gmra.mxu0 %vm356_vm3, %v855_v46 }
 0x5d8   :  { %1127 = vmatprep.mubr.msk.f32.mxu0 %vm356_vm3, %v856_v60 }
 0x5db   :  { %1128 = vmatmul.mubr.msk.f32.gmra.mxu0 %vm356_vm3, %v857_v61 }
 0x697   :  { %v1126_v11 = vpop.f32.mrf.mxu0 }
 0x698   :  { %v805_v30 = vadd.f32 %v1126_v11, %v709_v62 }
 0x699   :  { %v799_v31 = vpop.f32.mrf.mxu0 }
 0x69a   :  { %v819_v32 = vmax.f32 %v805_v30, 0.0  ;;  %v800_v33 = vadd.f32 %v799_v31, %v704_v63 }
 0x69b   :  { %v1129_v35 = vpop.f32.mrf.mxu0 }
 0x69c   :  { %823 = vst [vmem:[#allocation8 + $0x8] sm:$0xff] %v819_v32  ;;  %v818_v36 = vmax.f32 %v800_v33, 0.0  ;;  %v815_v37 = vadd.f32 %v1129_v35, %v719_v34 }
 0x69d   :  { %v809_v39 = vpop.f32.mrf.mxu0 }
 0x69e   :  { %822 = vst [vmem:[#allocation8] sm:$0xff] %v818_v36  ;;  %v821_v40 = vmax.f32 %v815_v37, 0.0  ;;  %v810_v1 = vadd.f32 %v809_v39, %v714_v38 }
 0x6a0   :  { %825 = vst [vmem:[#allocation8 + $0x18] sm:$0xff] %v821_v40  ;;  %v820_v2 = vmax.f32 %v810_v1, 0.0 }
 0x6a2   :  { %824 = vst [vmem:[#allocation8 + $0x10] sm:$0xff] %v820_v2 }
 0x6a3   :  { %1214 = shalt.err (!%p1211_p5)
}
 0x6a4   :  { %837 = dma.vmem_to_hbm [thread:$0]  %s832_s10, 512, %s1616_s7, [#allocation4], %s1231_s29, %s1231_s29, %s1232_s30  }
 0x6a5   :  { %1227 = dma.done.wait [#allocation4], 512  }
 0x6a6   :  { %1228 = vsyncadd [#allocation4], 4294966784 }
 0x6a7   :  { %841 = vsyncpa [#allocation3], 1 }
 0x6a8   :  { %842 = vsyncpa [#allocation6], 1 }
 0x6a9   :  { %843 = vsyncpa [#allocation4], 1 }

</bundles_post_ra>
